<compile_context>
chip_gen: v6e
topology: v6e:2x2x1
jax: 0.10.0
libtpu: 0.0.40
codegen_flags: <defaults>
</compile_context>

<pallas_src>
import functools

import jax
import jax.numpy as jnp
from jax.experimental import pallas as pl
from jax.experimental.pallas import tpu as pltpu


DEFAULT_GENETIC_CODE = [[100, 1, 0], [453, 1]]

_SUBLANE_MULT = {4: 8, 2: 16, 1: 32}   # native sublane tile per itemsize


# ----------------------------------------------------------------------------
# Minimal "GeneticInterpreter": compiles a genetic-code program into a pure
# elementwise jnp function.  Register 0 is implicitly the input ('y_true').
# ----------------------------------------------------------------------------
def compile_genetic_program(genetic_code):
    """Returns (program_fn, flops_per_elem, transcendentals_per_elem)."""
    flops = 0
    transcendentals = 0
    for instr in genetic_code:
        op = instr[0]
        if op in (200, 201, 202, 450):
            flops += 1
        elif op in (451, 452):
            transcendentals += 1
        elif op == 453:
            transcendentals += 1
            flops += 3                        # scale / add / scale around tanh

    def program_fn(x):
        regs = {0: x}                         # register 0 := input ('y_true')
        last_written = 0

        def get(r):
            # TODO(synk): exact GeneticInterpreter semantics for reads of an
            # undefined register are unpublished; fall back to the input.
            return regs.get(r, x)

        for instr in genetic_code:
            op = instr[0]
            args = instr[1:]
            if op == 100:                     # LOAD input into register args[0]
                regs[args[0]] = x
            elif op == 200:                   # ADD dst, a, b
                dst, a, b = args
                regs[dst] = get(a) + get(b)
            elif op == 201:                   # SUB dst, a, b
                dst, a, b = args
                regs[dst] = get(a) - get(b)
            elif op == 202:                   # MUL dst, a, b
                dst, a, b = args
                regs[dst] = get(a) * get(b)
            elif op == 450:                   # RELU reg
                regs[args[0]] = jnp.maximum(get(args[0]), 0.0)
            elif op == 451:                   # TANH reg
                regs[args[0]] = jnp.tanh(get(args[0]))
            elif op == 452:                   # EXP reg
                regs[args[0]] = jnp.exp(get(args[0]))
            elif op == 453:                   # SIGMOID reg -- single EUP op form
                v = get(args[0])
                regs[args[0]] = 0.5 * (jnp.tanh(0.5 * v) + 1.0)
            else:
                # Unknown opcode: no-op (mirrors interpreter's defensive fallback)
                continue
            last_written = args[0]
        return regs[last_written]

    return program_fn, flops, transcendentals


# ----------------------------------------------------------------------------
# Pallas kernel: applies the compiled genetic program elementwise on a block.
# ----------------------------------------------------------------------------
def _genetic_activation_kernel(x_ref, o_ref, *, program_fn, compute_dtype):
    x = x_ref[...]
    if x.dtype != compute_dtype:
        x = x.astype(compute_dtype)
    y = program_fn(x)
    if y.dtype != o_ref.dtype:
        y = y.astype(o_ref.dtype)
    o_ref[...] = y


# ----------------------------------------------------------------------------
# Chip-generation traits (best effort, defensive).
# ----------------------------------------------------------------------------
def _chip_traits():
    """Returns (num_tensorcores, target_block_bytes, vmem_limit_bytes, bf16_ok)."""
    kind = ""
    try:
        kind = jax.devices()[0].device_kind.lower()
    except Exception:
        pass
    if "v7" in kind:
        # 2 TensorCores, 64 MiB physical VMEM per TC: ~6 MiB blocks, in+out
        # double-buffered (~24 MiB) under a 48 MiB scoped limit.
        return 2, 6 << 20, 48 << 20, True
    if any(t in kind for t in ("v2", "v3", "v4", "v5")):
        # 1 TensorCore, 128 MiB VMEM; no bf16 VPU/EUP path -> compute in f32.
        return 1, 8 << 20, 64 << 20, False
    if "v6" in kind:
        # 1 TensorCore, 128 MiB VMEM; bf16 VPU/EUP available.
        return 1, 8 << 20, 64 << 20, True
    # Unknown chip: settings safe on every generation.
    return 1, 6 << 20, 48 << 20, True


# ----------------------------------------------------------------------------
# Layout / tiling heuristics.
# ----------------------------------------------------------------------------
def _round_up(v, m):
    return -(-v // m) * m


def _choose_lane_width(n):
    """Widest power-of-two multiple of 128 dividing n that keeps >= 8 rows."""
    for cand in (2048, 1024, 512, 256):
        if n % cand == 0 and n // cand >= 8:
            return cand
    return 128


def _choose_tile_rows(rows, row_bytes, sub, target_block_bytes, num_tc):
    """Rows per block: big lane-dense slabs; >=2 blocks per TensorCore on v7x."""
    if rows <= sub:
        return rows                               # tiny input: one full-extent block
    max_rows = max(sub, (target_block_bytes // row_bytes) // sub * sub)
    if num_tc <= 1:
        # v5e / v6e: one TensorCore -- extra grid steps are pure overhead, so
        # use a single full-extent block whenever it fits the VMEM budget.
        return rows if rows <= max_rows else max_rows
    # v7x: aim for >= 2 blocks per TensorCore so prefetch/writeback overlap compute.
    min_steps = 2 * num_tc
    tile = _round_up(pl.cdiv(rows, min_steps), sub)
    return max(sub, min(tile, max_rows))
    # TODO(synk): if xprof still shows exposed DMA on v7x, sweep
    # pipeline_mode=pl.Buffered(3) on the BlockSpecs (6x block must fit VMEM).


# ----------------------------------------------------------------------------
# Public wrapper.
# ----------------------------------------------------------------------------
def dynamic_activation(x, genetic_code=None):
    """Apply the genetic activation program to x (any shape) via Pallas."""
    if genetic_code is None:
        genetic_code = DEFAULT_GENETIC_CODE
    dtype = x.dtype
    if dtype not in (jnp.float32, jnp.bfloat16, jnp.float16):
        raise TypeError(f"DynamicActivation: unsupported dtype {dtype}")

    n = x.size
    if n == 0:
        return x

    num_tc, target_block_bytes, vmem_limit, bf16_ok = _chip_traits()
    compute_dtype = jnp.bfloat16 if (dtype == jnp.bfloat16 and bf16_ok) else jnp.float32
    itemsize = jnp.dtype(dtype).itemsize
    sub = _SUBLANE_MULT[itemsize]

    orig_shape = x.shape
    if n % 128 == 0:
        # Common path: flatten into a lane-dense (rows, lanes) slab (free reshape),
        # wide unmasked stores, no host-side padding.
        lanes = _choose_lane_width(n)
        rows = n // lanes
    else:
        # Ragged path: collapse leading dims and keep the original minor dim, so
        # raggedness is absorbed by Mosaic's internal tile padding / masked
        # partial-block stores -- no host-side pad + tail-slice HBM passes.
        lanes = orig_shape[-1] if x.ndim >= 1 else n
        rows = n // lanes
        # TODO(synk): a huge ragged 1-D input (rows == 1, lanes*itemsize beyond
        # the VMEM block budget) would need lane-dim tiling; not hit here.
    x2d = x.reshape(rows, lanes)

    row_bytes = max(1, _round_up(lanes, 128) * itemsize)   # VMEM footprint per row
    tile_rows = _choose_tile_rows(rows, row_bytes, sub, target_block_bytes, num_tc)
    grid = (pl.cdiv(rows, tile_rows),)   # ragged last row-block handled by Pallas

    program_fn, flops_pe, trans_pe = compile_genetic_program(genetic_code)
    kernel = functools.partial(_genetic_activation_kernel,
                               program_fn=program_fn, compute_dtype=compute_dtype)

    out2d = pl.pallas_call(
        kernel,
        out_shape=jax.ShapeDtypeStruct((rows, lanes), dtype),
        grid=grid,
        in_specs=[pl.BlockSpec((tile_rows, lanes), lambda i: (i, 0))],
        out_specs=pl.BlockSpec((tile_rows, lanes), lambda i: (i, 0)),
        compiler_params=pltpu.CompilerParams(
            dimension_semantics=("parallel",),
            vmem_limit_bytes=vmem_limit,
        ),
        cost_estimate=pl.CostEstimate(
            flops=flops_pe * n,
            transcendentals=trans_pe * n,
            bytes_accessed=2 * n * itemsize,
        ),
    )(x2d)

    return out2d.reshape(orig_shape)


# ----------------------------------------------------------------------------
# Reference (plain JAX) for a quick sanity check.
# ----------------------------------------------------------------------------
def dynamic_activation_ref(x, genetic_code=None):
    if genetic_code is None:
        genetic_code = DEFAULT_GENETIC_CODE
    program_fn, _, _ = compile_genetic_program(genetic_code)
    return program_fn(x.astype(jnp.float32)).astype(x.dtype)


if __name__ == "__main__":
    key = jax.random.PRNGKey(0)
    # NCHW input, matching typical conv-activation placement in the source model.
    x = jax.random.normal(key, (2, 4, 16, 16), dtype=jnp.float32)

    y = jax.block_until_ready(dynamic_activation(x))
    y_ref = dynamic_activation_ref(x)
    assert y.shape == x.shape and y.dtype == x.dtype
    assert jnp.allclose(y, y_ref, atol=1e-5, rtol=1e-5)

    # Ragged path: numel not a multiple of 128 -- handled in-kernel, no pad/slice.
    x_odd = jax.random.normal(jax.random.PRNGKey(1), (3, 5, 7), dtype=jnp.float32)
    y_odd = jax.block_until_ready(dynamic_activation(x_odd))
    assert jnp.allclose(y_odd, dynamic_activation_ref(x_odd), atol=1e-5, rtol=1e-5)

    # bf16 path: bf16 compute on v6e/v7x, f32 compute on v5e and older.
    x_bf = x.astype(jnp.bfloat16)
    y_bf = jax.block_until_ready(dynamic_activation(x_bf))
    assert y_bf.dtype == jnp.bfloat16
    assert jnp.allclose(y_bf.astype(jnp.float32),
                        dynamic_activation_ref(x_bf).astype(jnp.float32),
                        atol=2e-2, rtol=2e-2)

    print("KERNEL_OK")
</pallas_src>

<mosaic_0001>
module attributes {stable_mosaic.version = 11 : i64} {
  func.func @_genetic_activation_kernel(%arg0: i32, %arg1: memref<8x256xf32, #tpu.memory_space<vmem>>, %arg2: memref<8x256xf32, #tpu.memory_space<vmem>>) attributes {dimension_semantics = [#tpu.dimension_semantics<parallel>], iteration_bounds = array<i64: 1>, scalar_prefetch = 0 : i64, scratch_operands = 0 : i64, tpu.core_type = #tpu.core_type<tc>, window_params = [{transform_indices = @transform_0, window_bounds = array<i64: 8, 256>}, {transform_indices = @transform_1, window_bounds = array<i64: 8, 256>}]} {
    %c0 = arith.constant 0 : index
    %c0_0 = arith.constant 0 : index
    %0 = vector.load %arg1[%c0, %c0_0] : memref<8x256xf32, #tpu.memory_space<vmem>>, vector<8x256xf32>
    %cst = arith.constant 5.000000e-01 : f32
    %1 = vector.broadcast %cst : f32 to vector<8x256xf32>
    %2 = arith.mulf %1, %0 : vector<8x256xf32>
    %3 = math.tanh %2 : vector<8x256xf32>
    %cst_1 = arith.constant 1.000000e+00 : f32
    %4 = vector.broadcast %cst_1 : f32 to vector<8x256xf32>
    %5 = arith.addf %3, %4 : vector<8x256xf32>
    %cst_2 = arith.constant 5.000000e-01 : f32
    %6 = vector.broadcast %cst_2 : f32 to vector<8x256xf32>
    %7 = arith.mulf %6, %5 : vector<8x256xf32>
    %c0_3 = arith.constant 0 : index
    %c0_4 = arith.constant 0 : index
    %8 = vector.load %arg2[%c0_3, %c0_4] : memref<8x256xf32, #tpu.memory_space<vmem>>, vector<8x256xf32>
    tpu.vector_store %arg2[%c0_3, %c0_4], %7 {strides = array<i32>} : memref<8x256xf32, #tpu.memory_space<vmem>>, vector<8x256xf32>,
    return
  }
  func.func @transform_0(%arg0: i32) -> (i32, i32) {
    %c0_i32 = arith.constant 0 : i32
    %c0_i32_0 = arith.constant 0 : i32
    return %arg0, %c0_i32 : i32, i32
  }
  func.func @transform_1(%arg0: i32) -> (i32, i32) {
    %c0_i32 = arith.constant 0 : i32
    %c0_i32_0 = arith.constant 0 : i32
    return %arg0, %c0_i32 : i32, i32
  }
}

</mosaic_0001>

<bundles_post_ra>
// kernel: tpu_custom_call.1
= control target key start
LH: loop header
LB: loop body
LE: loop exit
PB: predicated region body
PF: predicated region fallthrough
CT: control target
= control target key end

     0   :  { %6 = vsyncpa [#allocation3], 0  ;;  %s116_s0 = inlined_call_operand.hbm [shape: f32[8,256], index: 0, kind: input, shape index: {}]   ;;  %s117_s1 = inlined_call_operand.hbm [shape: f32[8,256], index: 1, kind: output, shape index: {}]  }
   0x1   :  { %7 = vsyncpa [#allocation4], 0  ;;  %s98_s6 = smov [#allocation2]  }
   0x2   :  { %s14_s7 = sshll.u32 %s98_s6, 4  ;;  %s15_s7 = int_to_ptr.vmem [resolvable:$true] %s14_s7 }
   0x3   :  { %s62_s8 = scalar_lea.vmem %s15_s7, 256  ;;  %p67_p1 = scmp.lt.s32.totalorder %s15_s7, %s15_s7 }
   0x4   :  { %p63_p0 = scmp.ne.s32.totalorder %s15_s7, %s62_s8  ;;  %p68_p2 = scmp.lt.s32.totalorder %s62_s8, %s62_s8 }
   0x6   :  { %p69_p3 = por %p68_p2, %p67_p1 }
   0x8   :  { %p70_p4 = pnand %p69_p3, %p63_p0 }
   0xa   :  { %73 = shalt.err (!%p70_p4)
}
   0xb   :  { %17 = dma.hbm_to_vmem [thread:$0]  %s116_s0, 256, %s15_s7, [#allocation3]  }
   0xc   :  { %94 = dma.done.wait [#allocation3], 256  }
   0xd   :  { %95 = vsyncadd [#allocation3], 4294967040  ;;  %v21_v0 = vld [vmem:[#allocation2] sm:$0xff]  ;;  %v22_v1 = vld [vmem:[#allocation2 + $0x8] sm:$0xff]  ;;  %s99_s11 = smov [#allocation5]  }
   0xe   :  { %v23_v2 = vmul.f32 0.5, %v21_v0  ;;  %v24_v3 = vmul.f32 0.5, %v22_v1  ;;  %s39_s12 = sshll.u32 %s99_s11, 4  ;;  %s40_s12 = int_to_ptr.vmem [resolvable:$true] %s39_s12 }
   0xf   :  { %s74_s0 = scalar_lea.vmem %s40_s12, 256  ;;  %p79_p6 = scmp.lt.s32.totalorder %s40_s12, %s40_s12 }
  0x10   :  { %50 = vtanh.f32 %v23_v2  ;;  %p75_p5 = scmp.ne.s32.totalorder %s40_s12, %s74_s0  ;;  %p80_p7 = scmp.lt.s32.totalorder %s74_s0, %s74_s0 }
  0x11   :  { %52 = vtanh.f32 %v24_v3 }
  0x12   :  { %p81_p8 = por %p80_p7, %p79_p6 }
  0x14   :  { %p82_p9 = pnand %p81_p8, %p75_p5 }
  0x1d   :  { %v51_v4 = vpop.eup %50 }
  0x1e   :  { %v53_v5 = vpop.eup %52  ;;  %v27_v6 = vadd.f32 1.0, %v51_v4 }
  0x1f   :  { %v28_v7 = vadd.f32 1.0, %v53_v5 }
  0x20   :  { %v29_v8 = vmul.f32 0.5, %v27_v6 }
  0x21   :  { %v30_v9 = vmul.f32 0.5, %v28_v7 }
  0x22   :  { %31 = vst [vmem:[#allocation5] sm:$0xff] %v29_v8 }
  0x23   :  { %32 = vst [vmem:[#allocation5 + $0x8] sm:$0xff] %v30_v9 }
  0x24   :  { %85 = shalt.err (!%p82_p9)
}
  0x25   :  { %42 = dma.vmem_to_hbm [thread:$0]  %s40_s12, 256, %s117_s1, [#allocation4]  }
  0x26   :  { %96 = dma.done.wait [#allocation4], 256  }
  0x27   :  { %97 = vsyncadd [#allocation4], 4294967040 }
  0x28   :  { %46 = vsyncpa [#allocation3], 1 }
  0x29   :  { %47 = vsyncpa [#allocation4], 1 }

</bundles_post_ra>
